<compile_context>
chip_gen: v7x
topology: tpu7x:2x2x1
jax: 0.10.0
libtpu: 0.0.40
codegen_flags: <defaults>
</compile_context>

<pallas_src>
import functools

import jax
import jax.numpy as jnp
from jax.experimental import pallas as pl
from jax.experimental.pallas import tpu as pltpu


def _round_up(x, m):
    return ((x + m - 1) // m) * m


def _mlp_kernel(x_ref, w1_ref, b1_ref, w2_ref, b2_ref, w3_ref, b3_ref, o_ref):
    # hidden1 + ReLU
    h = jnp.dot(x_ref[...], w1_ref[...], preferred_element_type=jnp.float32)
    h = jnp.maximum(h + b1_ref[...], 0.0)
    # hidden2 + sigmoid (EUP)
    h = jnp.dot(h, w2_ref[...], preferred_element_type=jnp.float32)
    h = jax.nn.sigmoid(h + b2_ref[...])
    # predict (no activation)
    out = jnp.dot(h, w3_ref[...], preferred_element_type=jnp.float32)
    o_ref[...] = (out + b3_ref[...]).astype(o_ref.dtype)


@functools.partial(jax.jit, static_argnames=("block_b",))
def mlp_forward(x, w1, b1, w2, b2, w3, b3, *, block_b=256):
    """x: (B, n_input) f32. Weights wi: (in, out). Biases bi: (out,)."""
    B, n_input = x.shape
    n_hidden = w1.shape[1]
    n_output = w3.shape[1]

    # --- batch tiling ------------------------------------------------------
    # Small batch: one grid step (no per-step overhead on the 1-TC v5e/v6e).
    # Large batch: >= 4 steps so a 2-core v7x part gets >= 2 steps per core
    # (keeps the intra-core software pipeline alive), tile capped at block_b.
    block_b = max(8, _round_up(block_b, 8))
    B8 = _round_up(B, 8)
    if B8 <= block_b:
        block_b = B8
    else:
        block_b = min(block_b, max(128, _round_up(pl.cdiv(B, 4), 8)))
    grid = (pl.cdiv(B, block_b),)

    b1r = b1.reshape(1, n_hidden)
    b2r = b2.reshape(1, n_hidden)
    b3r = b3.reshape(1, n_output)

    # --- VMEM budget --------------------------------------------------------
    # Double-buffered x/out tiles + (default double-buffered) params; 2x
    # headroom for layout padding / internal scratch.  Only raise the scoped
    # limit when we might exceed v5e's 16 MiB default; cap at 75% of the
    # physical VMEM of the part we are actually compiling for.
    itemsize = 4
    tile_bytes = 2 * block_b * (n_input + n_output) * itemsize
    param_bytes = 2 * (n_input * n_hidden + n_hidden * n_hidden
                       + n_hidden * n_output + 2 * n_hidden + n_output) * itemsize
    vmem_est = 2 * (tile_bytes + param_bytes)
    compiler_kwargs = dict(dimension_semantics=("parallel",))
    if vmem_est > 12 * 1024 * 1024:
        try:
            phys_vmem = pltpu.get_tpu_info().vmem_capacity_bytes
        except Exception:
            phys_vmem = 64 * 1024 * 1024  # conservative (v7x)
        compiler_kwargs["vmem_limit_bytes"] = int(min(vmem_est, (phys_vmem * 3) // 4))

    cost = pl.CostEstimate(
        flops=2 * B * (n_input * n_hidden + n_hidden * n_hidden
                       + n_hidden * n_output),
        transcendentals=B * n_hidden,  # sigmoid
        bytes_accessed=itemsize * (B * (n_input + n_output)
                                   + n_input * n_hidden + n_hidden * n_hidden
                                   + n_hidden * n_output + 2 * n_hidden + n_output),
    )

    out = pl.pallas_call(
        _mlp_kernel,
        out_shape=jax.ShapeDtypeStruct((B, n_output), x.dtype),
        grid_spec=pl.GridSpec(
            grid=grid,
            in_specs=[
                pl.BlockSpec((block_b, n_input), lambda i: (i, 0)),    # x tile
                pl.BlockSpec((n_input, n_hidden), lambda i: (0, 0)),   # w1 (resident)
                pl.BlockSpec((1, n_hidden), lambda i: (0, 0)),         # b1
                pl.BlockSpec((n_hidden, n_hidden), lambda i: (0, 0)),  # w2 (resident)
                pl.BlockSpec((1, n_hidden), lambda i: (0, 0)),         # b2
                pl.BlockSpec((n_hidden, n_output), lambda i: (0, 0)),  # w3 (resident)
                pl.BlockSpec((1, n_output), lambda i: (0, 0)),         # b3
            ],
            out_specs=pl.BlockSpec((block_b, n_output), lambda i: (i, 0)),
        ),
        compiler_params=pltpu.CompilerParams(**compiler_kwargs),
        cost_estimate=cost,
    )(x, w1, b1r, w2, b2r, w3, b3r)

    return out


def init_params(key, n_input, n_hidden, n_output):
    """Deterministic PyTorch-style init: U(-1/sqrt(fan_in), 1/sqrt(fan_in)).

    Returns weights already transposed to (in_features, out_features)."""
    ks = jax.random.split(key, 6)

    def lin(kw, kb, fan_in, fan_out):
        bound = 1.0 / jnp.sqrt(jnp.float32(fan_in))
        w = jax.random.uniform(kw, (fan_in, fan_out), jnp.float32, -bound, bound)
        b = jax.random.uniform(kb, (fan_out,), jnp.float32, -bound, bound)
        return w, b

    w1, b1 = lin(ks[0], ks[1], n_input, n_hidden)
    w2, b2 = lin(ks[2], ks[3], n_hidden, n_hidden)
    w3, b3 = lin(ks[4], ks[5], n_hidden, n_output)
    return w1, b1, w2, b2, w3, b3


if __name__ == "__main__":
    n_input, n_hidden, n_output = 16, 32, 4
    batch = 512  # -> block_b=128, grid=4: 2 steps/core on v7x, cheap loop on v5e/v6e

    key = jax.random.PRNGKey(0)
    kx, kp = jax.random.split(key)
    x = jax.random.normal(kx, (batch, n_input), dtype=jnp.float32)
    params = init_params(kp, n_input, n_hidden, n_output)

    out = mlp_forward(x, *params)
    jax.block_until_ready(out)

    # Reference check in plain JAX (same math, same params).
    w1, b1, w2, b2, w3, b3 = params
    ref = jnp.maximum(x @ w1 + b1, 0.0)
    ref = jax.nn.sigmoid(ref @ w2 + b2)
    ref = ref @ w3 + b3
    assert out.shape == (batch, n_output)
    assert jnp.allclose(out, ref, atol=1e-5, rtol=1e-5)

    # Ragged-batch path: partial tile handled by Pallas output masking
    # (no wrapper-side pad / slice).
    out_small = mlp_forward(x[:37], *params)
    jax.block_until_ready(out_small)
    assert out_small.shape == (37, n_output)
    assert jnp.allclose(out_small, ref[:37], atol=1e-5, rtol=1e-5)

    # Single-step small-batch path.
    out_tiny = mlp_forward(x[:8], *params)
    jax.block_until_ready(out_tiny)
    assert jnp.allclose(out_tiny, ref[:8], atol=1e-5, rtol=1e-5)

    print("KERNEL_OK")
</pallas_src>

<mosaic_0001>
module attributes {stable_mosaic.version = 11 : i64} {
  func.func @_mlp_kernel(%arg0: i32, %arg1: memref<128x16xf32, #tpu.memory_space<vmem>>, %arg2: memref<16x32xf32, #tpu.memory_space<vmem>>, %arg3: memref<1x32xf32, #tpu.memory_space<vmem>>, %arg4: memref<32x32xf32, #tpu.memory_space<vmem>>, %arg5: memref<1x32xf32, #tpu.memory_space<vmem>>, %arg6: memref<32x4xf32, #tpu.memory_space<vmem>>, %arg7: memref<1x4xf32, #tpu.memory_space<vmem>>, %arg8: memref<128x4xf32, #tpu.memory_space<vmem>>) attributes {dimension_semantics = [#tpu.dimension_semantics<parallel>], iteration_bounds = array<i64: 4>, scalar_prefetch = 0 : i64, scratch_operands = 0 : i64, tpu.core_type = #tpu.core_type<tc>, window_params = [{transform_indices = @transform_0, window_bounds = array<i64: 128, 16>}, {pipeline_mode = #tpu.pipeline_mode<synchronous>, transform_indices = @transform_1, window_bounds = array<i64: 16, 32>}, {pipeline_mode = #tpu.pipeline_mode<synchronous>, transform_indices = @transform_2, window_bounds = array<i64: 1, 32>}, {pipeline_mode = #tpu.pipeline_mode<synchronous>, transform_indices = @transform_3, window_bounds = array<i64: 32, 32>}, {pipeline_mode = #tpu.pipeline_mode<synchronous>, transform_indices = @transform_4, window_bounds = array<i64: 1, 32>}, {pipeline_mode = #tpu.pipeline_mode<synchronous>, transform_indices = @transform_5, window_bounds = array<i64: 32, 4>}, {pipeline_mode = #tpu.pipeline_mode<synchronous>, transform_indices = @transform_6, window_bounds = array<i64: 1, 4>}, {transform_indices = @transform_7, window_bounds = array<i64: 128, 4>}]} {
    %c0 = arith.constant 0 : index
    %c0_0 = arith.constant 0 : index
    %0 = vector.load %arg1[%c0, %c0_0] : memref<128x16xf32, #tpu.memory_space<vmem>>, vector<128x16xf32>
    %c0_1 = arith.constant 0 : index
    %c0_2 = arith.constant 0 : index
    %1 = vector.load %arg2[%c0_1, %c0_2] : memref<16x32xf32, #tpu.memory_space<vmem>>, vector<16x32xf32>
    %cst = arith.constant dense<0.000000e+00> : vector<128x32xf32>
    %2 = tpu.matmul %0, %1, %cst {dimension_numbers = #tpu.dot_dimension_numbers<[1], [0], [0], [1], [0, 0, 1, 1], [], []>} : vector<128x16xf32>, vector<16x32xf32>, vector<128x32xf32> -> vector<128x32xf32>
    %c0_3 = arith.constant 0 : index
    %c0_4 = arith.constant 0 : index
    %3 = vector.load %arg3[%c0_3, %c0_4] : memref<1x32xf32, #tpu.memory_space<vmem>>, vector<1x32xf32>
    %4 = vector.broadcast %3 : vector<1x32xf32> to vector<128x32xf32>
    %5 = arith.addf %2, %4 : vector<128x32xf32>
    %cst_5 = arith.constant 0.000000e+00 : f32
    %6 = vector.broadcast %cst_5 : f32 to vector<128x32xf32>
    %7 = arith.maximumf %5, %6 : vector<128x32xf32>
    %c0_6 = arith.constant 0 : index
    %c0_7 = arith.constant 0 : index
    %8 = vector.load %arg4[%c0_6, %c0_7] : memref<32x32xf32, #tpu.memory_space<vmem>>, vector<32x32xf32>
    %cst_8 = arith.constant dense<0.000000e+00> : vector<128x32xf32>
    %9 = tpu.matmul %7, %8, %cst_8 {dimension_numbers = #tpu.dot_dimension_numbers<[1], [0], [0], [1], [0, 0, 1, 1], [], []>} : vector<128x32xf32>, vector<32x32xf32>, vector<128x32xf32> -> vector<128x32xf32>
    %c0_9 = arith.constant 0 : index
    %c0_10 = arith.constant 0 : index
    %10 = vector.load %arg5[%c0_9, %c0_10] : memref<1x32xf32, #tpu.memory_space<vmem>>, vector<1x32xf32>
    %11 = vector.broadcast %10 : vector<1x32xf32> to vector<128x32xf32>
    %12 = arith.addf %9, %11 : vector<128x32xf32>
    %13 = arith.negf %12 : vector<128x32xf32>
    %14 = math.exp %13 : vector<128x32xf32>
    %cst_11 = arith.constant 1.000000e+00 : f32
    %15 = vector.broadcast %cst_11 : f32 to vector<128x32xf32>
    %16 = arith.addf %15, %14 : vector<128x32xf32>
    %17 = arith.divf %15, %16 : vector<128x32xf32>
    %c0_12 = arith.constant 0 : index
    %c0_13 = arith.constant 0 : index
    %18 = vector.load %arg6[%c0_12, %c0_13] : memref<32x4xf32, #tpu.memory_space<vmem>>, vector<32x4xf32>
    %cst_14 = arith.constant dense<0.000000e+00> : vector<128x4xf32>
    %19 = tpu.matmul %17, %18, %cst_14 {dimension_numbers = #tpu.dot_dimension_numbers<[1], [0], [0], [1], [0, 0, 1, 1], [], []>} : vector<128x32xf32>, vector<32x4xf32>, vector<128x4xf32> -> vector<128x4xf32>
    %c0_15 = arith.constant 0 : index
    %c0_16 = arith.constant 0 : index
    %20 = vector.load %arg7[%c0_15, %c0_16] : memref<1x4xf32, #tpu.memory_space<vmem>>, vector<1x4xf32>
    %21 = vector.broadcast %20 : vector<1x4xf32> to vector<128x4xf32>
    %22 = arith.addf %19, %21 : vector<128x4xf32>
    %c0_17 = arith.constant 0 : index
    %c0_18 = arith.constant 0 : index
    %23 = vector.load %arg8[%c0_17, %c0_18] : memref<128x4xf32, #tpu.memory_space<vmem>>, vector<128x4xf32>
    tpu.vector_store %arg8[%c0_17, %c0_18], %22 {strides = array<i32>} : memref<128x4xf32, #tpu.memory_space<vmem>>, vector<128x4xf32>,
    return
  }
  func.func @transform_0(%arg0: i32) -> (i32, i32) {
    %c0_i32 = arith.constant 0 : i32
    %c0_i32_0 = arith.constant 0 : i32
    return %arg0, %c0_i32 : i32, i32
  }
  func.func @transform_1(%arg0: i32) -> (i32, i32) {
    %c0_i32 = arith.constant 0 : i32
    %c0_i32_0 = arith.constant 0 : i32
    %c0_i32_1 = arith.constant 0 : i32
    return %c0_i32, %c0_i32_0 : i32, i32
  }
  func.func @transform_2(%arg0: i32) -> (i32, i32) {
    %c0_i32 = arith.constant 0 : i32
    %c0_i32_0 = arith.constant 0 : i32
    %c0_i32_1 = arith.constant 0 : i32
    return %c0_i32, %c0_i32_0 : i32, i32
  }
  func.func @transform_3(%arg0: i32) -> (i32, i32) {
    %c0_i32 = arith.constant 0 : i32
    %c0_i32_0 = arith.constant 0 : i32
    %c0_i32_1 = arith.constant 0 : i32
    return %c0_i32, %c0_i32_0 : i32, i32
  }
  func.func @transform_4(%arg0: i32) -> (i32, i32) {
    %c0_i32 = arith.constant 0 : i32
    %c0_i32_0 = arith.constant 0 : i32
    %c0_i32_1 = arith.constant 0 : i32
    return %c0_i32, %c0_i32_0 : i32, i32
  }
  func.func @transform_5(%arg0: i32) -> (i32, i32) {
    %c0_i32 = arith.constant 0 : i32
    %c0_i32_0 = arith.constant 0 : i32
    %c0_i32_1 = arith.constant 0 : i32
    return %c0_i32, %c0_i32_0 : i32, i32
  }
  func.func @transform_6(%arg0: i32) -> (i32, i32) {
    %c0_i32 = arith.constant 0 : i32
    %c0_i32_0 = arith.constant 0 : i32
    %c0_i32_1 = arith.constant 0 : i32
    return %c0_i32, %c0_i32_0 : i32, i32
  }
  func.func @transform_7(%arg0: i32) -> (i32, i32) {
    %c0_i32 = arith.constant 0 : i32
    %c0_i32_0 = arith.constant 0 : i32
    return %arg0, %c0_i32 : i32, i32
  }
}

</mosaic_0001>

<bundles_post_ra>
// kernel: mlp_forward.1
= control target key start
LH: loop header
LB: loop body
LE: loop exit
PB: predicated region body
PF: predicated region fallthrough
CT: control target
= control target key end

     0   :  { %s1465_s24 = smov 0   ;;  %s1646_s0 = inlined_call_operand.vmem [shape: f32[512,16], index: 0, kind: input, shape index: {}]   ;;  %s1647_s1 = inlined_call_operand.vmem [shape: f32[16,32], index: 1, kind: input, shape index: {}]   ;;  %s1648_s2 = inlined_call_operand.vmem [shape: f32[1,32], index: 2, kind: input, shape index: {}]   ;;  %s1649_s3 = inlined_call_operand.vmem [shape: f32[32,32], index: 3, kind: input, shape index: {}]   ;;  %s1650_s4 = inlined_call_operand.vmem [shape: f32[1,32], index: 4, kind: input, shape index: {}]   ;;  %s1651_s5 = inlined_call_operand.vmem [shape: f32[32,4], index: 5, kind: input, shape index: {}]   ;;  %s1652_s6 = inlined_call_operand.vmem [shape: f32[1,4], index: 6, kind: input, shape index: {}]   ;;  %s1653_s7 = inlined_call_operand.vmem [shape: f32[512,4], index: 7, kind: output, shape index: {}]  }
   0x1 LB: > { %s1095_s25 = sadd.s32 4294967295, %s1423_s24   ;;  %p1099_p0 = scmp.ge.s32.totalorder %s1423_s24, 1  ;;  %s1423_s24 = sphi %s1465_s24, %s17_s24  }
   0x2   : > { %p238_p1 = scmp.lt.s32.totalorder %s1423_s24, 5 }
   0x4   : > { %p239_p2 = pnand %p1099_p0, %p238_p1 }
   0x5   : > { %v298_v0 = vld [vmem:[%s1647_s1] sm:$0xff] (!%p239_p2)  ;;  %v299_v1 = vld [vmem:[%s1647_s1 + $0x8] sm:$0xff] (!%p239_p2)  ;;  %s1100_s30 = sshll.u32 (!%p239_p2), %s1095_s25, 4  ;;  %vm307_vm0 = vcmask (!%p239_p2), 130048   ;;  %v519_v6 = vld [vmem:[%s1649_s3 + $0x10] sm:$0xff] (!%p239_p2)  ;;  %vm528_vm1 = vcmask (!%p239_p2), 261120  }
   0x6   : > { %242 = sbr.rel (%p239_p2) target bundleno = 724 (0x2d4), region = 48  ;;  %v517_v2 = vld [vmem:[%s1649_s3] sm:$0xff] (!%p239_p2)  ;;  %v1323_v3 = vpack.c.bf16 (!%p239_p2), %v299_v1, %v298_v0  ;;  %p271_p3 = scmp.lt.s32.totalorder (!%p239_p2), %s1100_s30, 63  ;;  %v518_v4 = vld [vmem:[%s1649_s3 + $0x8] sm:$0xff] (!%p239_p2)  ;;  %v520_v7 = vld [vmem:[%s1649_s3 + $0x18] sm:$0xff] (!%p239_p2)  ;;  %vm1022_vm2 = vcmask (!%p239_p2), 31744  }
   0x7   : > { %v1327_v5 = vpack.c.bf16 (!%p239_p2), %v518_v4, %v517_v2  ;;  %v1331_v12 = vpack.c.bf16 (!%p239_p2), %v520_v7, %v519_v6  ;;  %v1104_v25 = vld [vmem:[%s1648_s2] ss:$0 sm:$0xff] (!%p239_p2) }
   0x8   : > { %1324 = vmatprep.subr.bf16.mxu0 (!%p239_p2), %v1323_v3  ;;  %1343 = vmatprep.subr.bf16.mxu1 (!%p239_p2), %v1323_v3 }
   0x9   : > { %1326 = vmatpush3.bf16.msra.mxu0 (!%p239_p2), %v1323_v3  ;;  %1344 = vmatpush3.bf16.msra.mxu1 (!%p239_p2), %v1323_v3 }
   0xa   : > { %1328 = vmatprep.subr.bf16.mxu1 (!%p239_p2), %v1327_v5 }
   0xd   : > { %s1655_s30 = smov (!%p271_p3, %s1100_s30), 63 }
   0xe   : > { %s1101_s12 = sshll.u32 %s1655_s30, 3 }
   0xf   : > { %s1493_s15 = scalar_lea.vmem %s1646_s0, %s1101_s12  ;;  %s1609_s16 = scalar_lea.vmem %s1653_s7, %s1101_s12 }
  0x10   : > { %v282_v8 = vld [vmem:[%s1493_s15] sm:$0xff]  ;;  %v283_v9 = vld [vmem:[%s1493_s15 + $0x8] sm:$0xff]  ;;  %v284_v10 = vld [vmem:[%s1493_s15 + $0x10] sm:$0xff] }
  0x11   : > { %1235 = vmatprep.mubr.msk.f32.mxu0 %vm307_vm0, %v282_v8  ;;  %v290_v11 = vld [vmem:[%s1493_s15 + $0x40] sm:$0xff]  ;;  %v285_v13 = vld [vmem:[%s1493_s15 + $0x18] sm:$0xff]  ;;  %v291_v14 = vld [vmem:[%s1493_s15 + $0x48] sm:$0xff] }
  0x12   : > { %1236 = vmatmul.mubr.msk.f32.vlgmr.msra.gmra.mrb[0].mxu0 %vm307_vm0, %v283_v9  ;;  %1247 = vmatprep.mubr.msk.f32.mxu1 %vm307_vm0, %v290_v11  ;;  %v292_v15 = vld [vmem:[%s1493_s15 + $0x50] sm:$0xff]  ;;  %v286_v16 = vld [vmem:[%s1493_s15 + $0x20] sm:$0xff]  ;;  %v293_v17 = vld [vmem:[%s1493_s15 + $0x58] sm:$0xff] }
  0x13   : > { %1238 = vmatprep.mubr.msk.f32.mxu0 %vm307_vm0, %v284_v10  ;;  %1248 = vmatmul.mubr.msk.f32.vlgmr.msra.gmra.mrb[0].mxu1 %vm307_vm0, %v291_v14  ;;  %v294_v18 = vld [vmem:[%s1493_s15 + $0x60] sm:$0xff]  ;;  %v287_v19 = vld [vmem:[%s1493_s15 + $0x28] sm:$0xff]  ;;  %v288_v20 = vld [vmem:[%s1493_s15 + $0x30] sm:$0xff] }
  0x14   : > { %1250 = vmatprep.mubr.msk.f32.mxu1 %vm307_vm0, %v292_v15  ;;  %1330 = vmatpush3.bf16.msra.mxu1 %v1327_v5  ;;  %v295_v21 = vld [vmem:[%s1493_s15 + $0x68] sm:$0xff]  ;;  %v296_v22 = vld [vmem:[%s1493_s15 + $0x70] sm:$0xff]  ;;  %v289_v23 = vld [vmem:[%s1493_s15 + $0x38] sm:$0xff] }
  0x15   : > { %1332 = vmatprep.subr.bf16.mxu1 %v1331_v12  ;;  %v297_v24 = vld [vmem:[%s1493_s15 + $0x78] sm:$0xff]  ;;  %v818_v10 = vld [vmem:[%s1651_s5] sm:$0xff]  ;;  %v819_v11 = vld [vmem:[%s1651_s5 + $0x8] sm:$0xff] }
  0x16   : > { %1239 = vmatmul.mubr.msk.f32.gmra.mrb[2].mxu0 %vm307_vm0, %v285_v13  ;;  %v820_v13 = vld [vmem:[%s1651_s5 + $0x10] sm:$0xff]  ;;  %v821_v14 = vld [vmem:[%s1651_s5 + $0x18] sm:$0xff] }
  0x17   : > { %1241 = vmatprep.mubr.msk.f32.mxu0 %vm307_vm0, %v286_v16  ;;  %1251 = vmatmul.mubr.msk.f32.gmra.mrb[2].mxu1 %vm307_vm0, %v293_v17  ;;  %v1339_v15 = vpack.c.bf16 %v821_v14, %v820_v13  ;;  %v1567_v16 = vld [vmem:[%s1650_s4] ss:$0 sm:$0xff] }
  0x18   : > { %1253 = vmatprep.mubr.msk.f32.mxu1 %vm307_vm0, %v294_v18  ;;  %1334 = vmatpush3.bf16.msra.mxu1 %v1331_v12  ;;  %v1335_v12 = vpack.c.bf16 %v819_v11, %v818_v10 }
  0x1a   : > { %1242 = vmatmul.mubr.msk.f32.gmra.mrb[4].mxu0 %vm307_vm0, %v287_v19  ;;  %1336 = vmatprep.subr.bf16.mxu0 %v1335_v12 }
  0x1b   : > { %1244 = vmatprep.mubr.msk.f32.mxu0 %vm307_vm0, %v288_v20  ;;  %1254 = vmatmul.mubr.msk.f32.gmra.mrb[4].mxu1 %vm307_vm0, %v295_v21 }
  0x1c   : > { %1256 = vmatprep.mubr.msk.f32.mxu1 %vm307_vm0, %v296_v22  ;;  %1338 = vmatpush3.bf16.msra.mxu0 %v1335_v12 }
  0x1d   : > { %1340 = vmatprep.subr.bf16.mxu0 %v1339_v15 }
  0x1e   : > { %1245 = vmatmul.mubr.msk.f32.gmra.mrb[6].mxu0 %vm307_vm0, %v289_v23 }
  0x1f   : > { %1257 = vmatmul.mubr.msk.f32.gmra.mrb[6].mxu1 %vm307_vm0, %v297_v24 }
  0x20   : > { %1342 = vmatpush3.bf16.msra.mxu0 %v1339_v15 }
  0xe5   : > { %v1237_v26 = vpop.f32.mrb[0].mxu0 }
  0xe6   : > { %v428_v27 = vadd.f32 %v1237_v26, %v1104_v25  ;;  %v422_v28 = vpop.f32.mrb[1].mxu0  ;;  %v1249_v30 = vpop.f32.mrb[0].mxu1 }
  0xe7   : > { %v423_v29 = vadd.f32 %v1104_v25, %v422_v28  ;;  %v462_v31 = vpop.f32.mrb[1].mxu1  ;;  %v468_v61 = vadd.f32 %v1249_v30, %v1104_v25 }
  0xe8   : > { %v502_v34 = vmax.f32 %v428_v27, 0.0  ;;  %v463_v50 = vadd.f32 %v1104_v25, %v462_v31 }
  0xe9   : > { %v501_v32 = vmax.f32 %v423_v29, 0.0  ;;  %v1240_v33 = vpop.f32.mrb[2].mxu0  ;;  %v510_v0 = vmax.f32 %v468_v61, 0.0 }
  0xea   : > { %v438_v35 = vadd.f32 %v1240_v33, %v1104_v25  ;;  %v432_v36 = vpop.f32.mrb[3].mxu0  ;;  %v1252_v38 = vpop.f32.mrb[2].mxu1  ;;  %v509_v58 = vmax.f32 %v463_v50, 0.0 }
  0xeb   : > { %v433_v37 = vadd.f32 %v1104_v25, %v432_v36  ;;  %1267 = vmatprep.mubr.msk.f32.mxu1 %vm528_vm1, %v501_v32  ;;  %v472_v39 = vpop.f32.mrb[3].mxu1  ;;  %v478_v1 = vadd.f32 %v1252_v38, %v1104_v25 }
  0xec   : > { %1268 = vmatmul.mubr.msk.f32.vlgmr.msra.gmra.mrb[8].mxu1 %vm528_vm1, %v502_v34  ;;  %v504_v42 = vmax.f32 %v438_v35, 0.0  ;;  %v473_v59 = vadd.f32 %v1104_v25, %v472_v39 }
  0xed   : > { %v503_v40 = vmax.f32 %v433_v37, 0.0  ;;  %v1243_v41 = vpop.f32.mrb[4].mxu0  ;;  %v512_v4 = vmax.f32 %v478_v1, 0.0 }
  0xee   : > { %v448_v43 = vadd.f32 %v1243_v41, %v1104_v25  ;;  %v442_v44 = vpop.f32.mrb[5].mxu0  ;;  %v1255_v46 = vpop.f32.mrb[4].mxu1  ;;  %v511_v62 = vmax.f32 %v473_v59, 0.0 }
  0xef   : > { %v443_v45 = vadd.f32 %v1104_v25, %v442_v44  ;;  %1270 = vmatprep.mubr.msk.f32.mxu1 %vm528_vm1, %v503_v40  ;;  %v482_v47 = vpop.f32.mrb[5].mxu1  ;;  %v488_v5 = vadd.f32 %v1255_v46, %v1104_v25 }
  0xf0   : > { %1271 = vmatmul.mubr.msk.f32.gmra.mrb[10].mxu1 %vm528_vm1, %v504_v42  ;;  %v506_v51 = vmax.f32 %v448_v43, 0.0  ;;  %v483_v63 = vadd.f32 %v1104_v25, %v482_v47 }
  0xf1   : > { %v505_v48 = vmax.f32 %v443_v45, 0.0  ;;  %v1246_v49 = vpop.f32.mrb[6].mxu0  ;;  %v514_v7 = vmax.f32 %v488_v5, 0.0 }
  0xf2   : > { %v458_v52 = vadd.f32 %v1246_v49, %v1104_v25  ;;  %v452_v53 = vpop.f32.mrb[7].mxu0  ;;  %v1258_v55 = vpop.f32.mrb[6].mxu1  ;;  %v513_v2 = vmax.f32 %v483_v63, 0.0 }
  0xf3   : > { %v453_v54 = vadd.f32 %v1104_v25, %v452_v53  ;;  %1273 = vmatprep.mubr.msk.f32.mxu1 %vm528_vm1, %v505_v48  ;;  %v492_v56 = vpop.f32.mrb[7].mxu1  ;;  %v498_v8 = vadd.f32 %v1258_v55, %v1104_v25 }
  0xf4   : > { %1274 = vmatmul.mubr.msk.f32.gmra.mrb[12].mxu1 %vm528_vm1, %v506_v51  ;;  %v508_v60 = vmax.f32 %v458_v52, 0.0  ;;  %v493_v3 = vadd.f32 %v1104_v25, %v492_v56 }
  0xf5   : > { %v507_v57 = vmax.f32 %v453_v54, 0.0  ;;  %v516_v9 = vmax.f32 %v498_v8, 0.0 }
  0xf6   : > { %v515_v6 = vmax.f32 %v493_v3, 0.0 }
  0xf7   : > { %1276 = vmatprep.mubr.msk.f32.mxu1 %vm528_vm1, %v507_v57 }
  0xf8   : > { %1277 = vmatmul.mubr.msk.f32.gmra.mrb[14].mxu1 %vm528_vm1, %v508_v60 }
  0xf9   : > { %1279 = vmatprep.mubr.msk.f32.mxu1 %vm528_vm1, %v509_v58 }
  0xfc   : > { %1280 = vmatmul.mubr.msk.f32.gmra.mrb[16].mxu1 %vm528_vm1, %v510_v0 }
  0xfd   : > { %1282 = vmatprep.mubr.msk.f32.mxu1 %vm528_vm1, %v511_v62 }
 0x100   : > { %1283 = vmatmul.mubr.msk.f32.gmra.mrb[18].mxu1 %vm528_vm1, %v512_v4 }
 0x101   : > { %1285 = vmatprep.mubr.msk.f32.mxu1 %vm528_vm1, %v513_v2 }
 0x104   : > { %1286 = vmatmul.mubr.msk.f32.gmra.mrb[20].mxu1 %vm528_vm1, %v514_v7 }
 0x105   : > { %1288 = vmatprep.mubr.msk.f32.mxu1 %vm528_vm1, %v515_v6 }
 0x108   : > { %1289 = vmatmul.mubr.msk.f32.gmra.mrb[22].mxu1 %vm528_vm1, %v516_v9 }
 0x1bf   : > { %v1269_v17 = vpop.f32.mrb[8].mxu1 }
 0x1c0   : > { %v649_v18 = vadd.f32 %v1269_v17, %v1567_v16  ;;  %v643_v19 = vpop.f32.mrb[9].mxu1 }
 0x1c1   : > { %v644_v20 = vadd.f32 %v1567_v16, %v643_v19 }
 0x1c2   : > { %v1139_v21 = vmul.f32 -1.442695, %v649_v18 }
 0x1c3   : > { %v1138_v22 = vmul.f32 -1.442695, %v644_v20  ;;  %v1272_v23 = vpop.f32.mrb[10].mxu1 }
 0x1c4   : > { %1353 = vpow2.f32 %v1139_v21  ;;  %v659_v24 = vadd.f32 %v1272_v23, %v1567_v16  ;;  %v653_v25 = vpop.f32.mrb[11].mxu1 }
 0x1c5   : > { %1355 = vpow2.f32 %v1138_v22  ;;  %v654_v26 = vadd.f32 %v1567_v16, %v653_v25 }
 0x1c6   : > { %v1141_v27 = vmul.f32 -1.442695, %v659_v24 }
 0x1c7   : > { %v1140_v28 = vmul.f32 -1.442695, %v654_v26  ;;  %v1275_v29 = vpop.f32.mrb[12].mxu1 }
 0x1c8   : > { %1357 = vpow2.f32 %v1141_v27  ;;  %v669_v30 = vadd.f32 %v1275_v29, %v1567_v16  ;;  %v663_v31 = vpop.f32.mrb[13].mxu1 }
 0x1c9   : > { %1359 = vpow2.f32 %v1140_v28  ;;  %v664_v32 = vadd.f32 %v1567_v16, %v663_v31 }
 0x1ca   : > { %v1143_v33 = vmul.f32 -1.442695, %v669_v30 }
 0x1cb   : > { %v1142_v34 = vmul.f32 -1.442695, %v664_v32  ;;  %v1278_v35 = vpop.f32.mrb[14].mxu1 }
 0x1cc   : > { %1361 = vpow2.f32 %v1143_v33  ;;  %v679_v36 = vadd.f32 %v1278_v35, %v1567_v16  ;;  %v673_v37 = vpop.f32.mrb[15].mxu1 }
 0x1cd   : > { %1363 = vpow2.f32 %v1142_v34  ;;  %v674_v38 = vadd.f32 %v1567_v16, %v673_v37 }
 0x1ce   : > { %v1354_v39 = vpop.eup %1353  ;;  %v1145_v40 = vmul.f32 -1.442695, %v679_v36 }
 0x1cf   : > { %v1356_v41 = vpop.eup %1355  ;;  %v771_v42 = vadd.f32 1.0, %v1354_v39  ;;  %v1144_v43 = vmul.f32 -1.442695, %v674_v38  ;;  %v1281_v44 = vpop.f32.mrb[16].mxu1 }
 0x1d0   : > { %v770_v45 = vadd.f32 1.0, %v1356_v41  ;;  %1365 = vpow2.f32 %v1145_v40  ;;  %v689_v46 = vadd.f32 %v1281_v44, %v1567_v16  ;;  %v683_v47 = vpop.f32.mrb[17].mxu1 }
 0x1d1   : > { %1367 = vrcp.f32 %v771_v42  ;;  %v684_v48 = vadd.f32 %v1567_v16, %v683_v47 }
 0x1d2   : > { %v1358_v49 = vpop.eup %1357  ;;  %1369 = vrcp.f32 %v770_v45  ;;  %v1147_v50 = vmul.f32 -1.442695, %v689_v46 }
 0x1d3   : > { %v1360_v51 = vpop.eup %1359  ;;  %v773_v52 = vadd.f32 1.0, %v1358_v49  ;;  %1371 = vpow2.f32 %v1144_v43  ;;  %v1146_v53 = vmul.f32 -1.442695, %v684_v48  ;;  %v1284_v54 = vpop.f32.mrb[18].mxu1  ;;  %v1154_v49 = vld [vmem:[%s1652_s6] ss:$0 sm:$0xff] }
 0x1d4   : > { %v772_v55 = vadd.f32 1.0, %v1360_v51  ;;  %1373 = vpow2.f32 %v1147_v50  ;;  %v699_v56 = vadd.f32 %v1284_v54, %v1567_v16  ;;  %v693_v57 = vpop.f32.mrb[19].mxu1 }
 0x1d5   : > { %1375 = vrcp.f32 %v773_v52  ;;  %v694_v58 = vadd.f32 %v1567_v16, %v693_v57 }
 0x1d6   : > { %v1362_v59 = vpop.eup %1361  ;;  %1377 = vrcp.f32 %v772_v55  ;;  %v1149_v60 = vmul.f32 -1.442695, %v699_v56 }
 0x1d7   : > { %v1364_v61 = vpop.eup %1363  ;;  %v775_v62 = vadd.f32 1.0, %v1362_v59  ;;  %1379 = vpow2.f32 %v1146_v53  ;;  %v1148_v63 = vmul.f32 -1.442695, %v694_v58  ;;  %v1287_v0 = vpop.f32.mrb[20].mxu1 }
 0x1d8   : > { %v774_v1 = vadd.f32 1.0, %v1364_v61  ;;  %1381 = vpow2.f32 %v1149_v60  ;;  %v709_v2 = vadd.f32 %v1287_v0, %v1567_v16  ;;  %v703_v3 = vpop.f32.mrb[21].mxu1 }
 0x1d9   : > { %1383 = vrcp.f32 %v775_v62  ;;  %v704_v4 = vadd.f32 %v1567_v16, %v703_v3 }
 0x1da   : > { %v1366_v5 = vpop.eup %1365  ;;  %1385 = vrcp.f32 %v774_v1  ;;  %v1151_v6 = vmul.f32 -1.442695, %v709_v2 }
 0x1db   : > { %v1368_v7 = vpop.eup %1367  ;;  %1387 = vpow2.f32 %v1148_v63  ;;  %v1150_v8 = vmul.f32 -1.442695, %v704_v4  ;;  %v1290_v9 = vpop.f32.mrb[22].mxu1  ;;  %v777_v14 = vadd.f32 1.0, %v1366_v5 }
 0x1dc   : > { %v1370_v10 = vpop.eup %1369  ;;  %1389 = vpow2.f32 %v1151_v6  ;;  %v719_v11 = vadd.f32 %v1290_v9, %v1567_v16  ;;  %v713_v12 = vpop.f32.mrb[23].mxu1 }
 0x1dd   : > { %v1372_v13 = vpop.eup %1371  ;;  %v714_v15 = vadd.f32 %v1567_v16, %v713_v12  ;;  %1299 = vmatprep.mubr.msk.f32.mxu0 %vm528_vm1, %v1370_v10  ;;  %1391 = vpow2.f32 %v1150_v8 }
 0x1de   : > { %v1374_v17 = vpop.eup %1373  ;;  %v776_v18 = vadd.f32 1.0, %v1372_v13  ;;  %v1153_v19 = vmul.f32 -1.442695, %v719_v11  ;;  %1300 = vmatmul.mubr.msk.f32.vlgmr.msra.gmra.mrb[8].mxu0 %vm528_vm1, %v1368_v7 }
 0x1df   : > { %v1376_v20 = vpop.eup %1375  ;;  %v1152_v21 = vmul.f32 -1.442695, %v714_v15  ;;  %v779_v24 = vadd.f32 1.0, %v1374_v17 }
 0x1e0   : > { %v1378_v22 = vpop.eup %1377  ;;  %1393 = vrcp.f32 %v776_v18 }
 0x1e1   : > { %v1380_v23 = vpop.eup %1379  ;;  %1395 = vrcp.f32 %v777_v14  ;;  %1302 = vmatprep.mubr.msk.f32.mxu0 %vm528_vm1, %v1378_v22 }
 0x1e2   : > { %v1382_v25 = vpop.eup %1381  ;;  %v778_v26 = vadd.f32 1.0, %v1380_v23  ;;  %1397 = vpow2.f32 %v1153_v19  ;;  %1303 = vmatmul.mubr.msk.f32.gmra.mrb[10].mxu0 %vm528_vm1, %v1376_v20 }
 0x1e3   : > { %v1384_v16 = vpop.eup %1383  ;;  %1399 = vpow2.f32 %v1152_v21  ;;  %v781_v29 = vadd.f32 1.0, %v1382_v25 }
 0x1e4   : > { %v1386_v27 = vpop.eup %1385  ;;  %1401 = vrcp.f32 %v778_v26 }
 0x1e5   : > { %v1388_v28 = vpop.eup %1387  ;;  %1403 = vrcp.f32 %v779_v24  ;;  %1305 = vmatprep.mubr.msk.f32.mxu0 %vm528_vm1, %v1386_v27 }
 0x1e6   : > { %v1390_v30 = vpop.eup %1389  ;;  %v780_v31 = vadd.f32 1.0, %v1388_v28  ;;  %1306 = vmatmul.mubr.msk.f32.gmra.mrb[12].mxu0 %vm528_vm1, %v1384_v16 }
 0x1e7   : > { %v1392_v32 = vpop.eup %1391  ;;  %v783_v33 = vadd.f32 1.0, %v1390_v30 }
 0x1e8   : > { %1405 = vrcp.f32 %v780_v31  ;;  %v782_v34 = vadd.f32 1.0, %v1392_v32 }
 0x1e9   : > { %1407 = vrcp.f32 %v781_v29 }
 0x1ea   : > { %v1394_v35 = vpop.eup %1393  ;;  %1409 = vrcp.f32 %v782_v34 }
 0x1eb   : > { %v1396_v36 = vpop.eup %1395  ;;  %1308 = vmatprep.mubr.msk.f32.mxu0 %vm528_vm1, %v1394_v35  ;;  %1411 = vrcp.f32 %v783_v33 }
 0x1ec   : > { %v1398_v37 = vpop.eup %1397  ;;  %1309 = vmatmul.mubr.msk.f32.gmra.mrb[14].mxu0 %vm528_vm1, %v1396_v36 }
 0x1ed   : > { %v1400_v38 = vpop.eup %1399  ;;  %v785_v39 = vadd.f32 1.0, %v1398_v37 }
 0x1ee   : > { %v1402_v40 = vpop.eup %1401  ;;  %v784_v41 = vadd.f32 1.0, %v1400_v38 }
 0x1ef   : > { %v1404_v42 = vpop.eup %1403  ;;  %1311 = vmatprep.mubr.msk.f32.mxu0 %vm528_vm1, %v1402_v40 }
 0x1f0   : > { %1413 = vrcp.f32 %v784_v41  ;;  %1312 = vmatmul.mubr.msk.f32.gmra.mrb[16].mxu0 %vm528_vm1, %v1404_v42 }
 0x1f1   : > { %1415 = vrcp.f32 %v785_v39 }
 0x1f2   : > { %v1406_v43 = vpop.eup %1405 }
 0x1f3   : > { %v1408_v44 = vpop.eup %1407  ;;  %1314 = vmatprep.mubr.msk.f32.mxu0 %vm528_vm1, %v1406_v43 }
 0x1f4   : > { %1315 = vmatmul.mubr.msk.f32.gmra.mrb[18].mxu0 %vm528_vm1, %v1408_v44  ;;  %v1410_v45 = vpop.eup %1409 }
 0x1f5   : > { %1317 = vmatprep.mubr.msk.f32.mxu0 %vm528_vm1, %v1410_v45  ;;  %v1412_v46 = vpop.eup %1411 }
 0x1f8   : > { %1318 = vmatmul.mubr.msk.f32.gmra.mrb[20].mxu0 %vm528_vm1, %v1412_v46 }
 0x1fa   : > { %v1414_v47 = vpop.eup %1413 }
 0x1fb   : > { %v1416_v48 = vpop.eup %1415  ;;  %1320 = vmatprep.mubr.msk.f32.mxu0 %vm528_vm1, %v1414_v47 }
 0x1fc   : > { %1321 = vmatmul.mubr.msk.f32.gmra.mrb[22].mxu0 %vm528_vm1, %v1416_v48 }
 0x2b1   : > { %v1301_v50 = vpop.f32.mrb[8].mxu0 }
 0x2b2   : > { %v949_v51 = vadd.f32 %v1301_v50, %v1154_v49  ;;  %v943_v52 = vpop.f32.mrb[9].mxu0 }
 0x2b3   : > { %v944_v53 = vadd.f32 %v1154_v49, %v943_v52 }
 0x2b4   : > { %1024 = vst.msk [vmem:[%s1609_s16 + $0x8] sm:$0xff] %vm1022_vm2, %v949_v51 }
 0x2b5   : > { %1023 = vst.msk [vmem:[%s1609_s16] sm:$0xff] %vm1022_vm2, %v944_v53  ;;  %v1304_v54 = vpop.f32.mrb[10].mxu0 }
 0x2b6   : > { %v959_v55 = vadd.f32 %v1304_v54, %v1154_v49  ;;  %v953_v56 = vpop.f32.mrb[11].mxu0 }
 0x2b7   : > { %v954_v57 = vadd.f32 %v1154_v49, %v953_v56 }
 0x2b8   : > { %1026 = vst.msk [vmem:[%s1609_s16 + $0x18] sm:$0xff] %vm1022_vm2, %v959_v55 }
 0x2b9   : > { %1025 = vst.msk [vmem:[%s1609_s16 + $0x10] sm:$0xff] %vm1022_vm2, %v954_v57  ;;  %v1307_v58 = vpop.f32.mrb[12].mxu0 }
 0x2ba   : > { %v969_v59 = vadd.f32 %v1307_v58, %v1154_v49  ;;  %v963_v60 = vpop.f32.mrb[13].mxu0 }
 0x2bb   : > { %v964_v61 = vadd.f32 %v1154_v49, %v963_v60 }
 0x2bc   : > { %1028 = vst.msk [vmem:[%s1609_s16 + $0x28] sm:$0xff] %vm1022_vm2, %v969_v59 }
 0x2bd   : > { %1027 = vst.msk [vmem:[%s1609_s16 + $0x20] sm:$0xff] %vm1022_vm2, %v964_v61 }
 0x2bf   : > { %v1310_v62 = vpop.f32.mrb[14].mxu0 }
 0x2c0   : > { %v979_v63 = vadd.f32 %v1310_v62, %v1154_v49  ;;  %v973_v0 = vpop.f32.mrb[15].mxu0 }
 0x2c1   : > { %v974_v1 = vadd.f32 %v1154_v49, %v973_v0 }
 0x2c2   : > { %1030 = vst.msk [vmem:[%s1609_s16 + $0x38] sm:$0xff] %vm1022_vm2, %v979_v63 }
 0x2c3   : > { %1029 = vst.msk [vmem:[%s1609_s16 + $0x30] sm:$0xff] %vm1022_vm2, %v974_v1  ;;  %v1313_v2 = vpop.f32.mrb[16].mxu0 }
 0x2c4   : > { %v989_v3 = vadd.f32 %v1313_v2, %v1154_v49  ;;  %v983_v4 = vpop.f32.mrb[17].mxu0 }
 0x2c5   : > { %v984_v5 = vadd.f32 %v1154_v49, %v983_v4 }
 0x2c6   : > { %1032 = vst.msk [vmem:[%s1609_s16 + $0x48] sm:$0xff] %vm1022_vm2, %v989_v3 }
 0x2c7   : > { %1031 = vst.msk [vmem:[%s1609_s16 + $0x40] sm:$0xff] %vm1022_vm2, %v984_v5  ;;  %v1316_v6 = vpop.f32.mrb[18].mxu0 }
 0x2c8   : > { %v999_v7 = vadd.f32 %v1316_v6, %v1154_v49  ;;  %v993_v8 = vpop.f32.mrb[19].mxu0 }
 0x2c9   : > { %v994_v9 = vadd.f32 %v1154_v49, %v993_v8 }
 0x2ca   : > { %1034 = vst.msk [vmem:[%s1609_s16 + $0x58] sm:$0xff] %vm1022_vm2, %v999_v7 }
 0x2cb   : > { %1033 = vst.msk [vmem:[%s1609_s16 + $0x50] sm:$0xff] %vm1022_vm2, %v994_v9  ;;  %v1319_v10 = vpop.f32.mrb[20].mxu0 }
 0x2cc   : > { %v1009_v11 = vadd.f32 %v1319_v10, %v1154_v49  ;;  %v1003_v12 = vpop.f32.mrb[21].mxu0 }
 0x2cd   : > { %v1004_v13 = vadd.f32 %v1154_v49, %v1003_v12 }
 0x2ce   : > { %1036 = vst.msk [vmem:[%s1609_s16 + $0x68] sm:$0xff] %vm1022_vm2, %v1009_v11 }
 0x2cf   : > { %1035 = vst.msk [vmem:[%s1609_s16 + $0x60] sm:$0xff] %vm1022_vm2, %v1004_v13  ;;  %v1322_v14 = vpop.f32.mrb[22].mxu0 }
 0x2d0   : > { %v1019_v15 = vadd.f32 %v1322_v14, %v1154_v49  ;;  %v1013_v17 = vpop.f32.mrb[23].mxu0 }
 0x2d1   : > { %v1014_v18 = vadd.f32 %v1154_v49, %v1013_v17 }
 0x2d2   : > { %1038 = vst.msk [vmem:[%s1609_s16 + $0x78] sm:$0xff] %vm1022_vm2, %v1019_v15 }
 0x2d3   : > { %1037 = vst.msk [vmem:[%s1609_s16 + $0x70] sm:$0xff] %vm1022_vm2, %v1014_v18 }
 0x2d4 PF: > { %s17_s24 = sadd.s32 1, %s1423_s24  }
 0x2d5   : > { %p14_p4 = scmp.ge.s32.totalorder %s17_s24, 6  }
 0x2d7   :  { %16 = sbr.rel (!%p14_p4) target bundleno = 1 (0x1), region = 78 }

</bundles_post_ra>
